<compile_context>
chip_gen: v7x
topology: tpu7x:2x2x1
jax: 0.10.0
libtpu: 0.0.40
codegen_flags: <defaults>
</compile_context>

<pallas_src>
import functools

import jax
import jax.numpy as jnp
from jax import lax
from jax.experimental import pallas as pl
from jax.experimental.pallas import tpu as pltpu


def _fidelity_kernel(out_ref, lab_ref, psum_ref, pcnt_ref, *, hw, tile_hw, need_mask):
    ti = pl.program_id(1)

    # psum/pcnt output blocks are resident across the tile axis -> accumulators.
    @pl.when(ti == 0)
    def _init():
        psum_ref[...] = jnp.zeros_like(psum_ref)
        pcnt_ref[...] = jnp.zeros_like(pcnt_ref)

    # Blocks are (1, C, TILE_HW): channels on the sublane axis, pixels lane-dense.
    o = out_ref[0].astype(jnp.float32)            # (C, TILE_HW)
    l = lab_ref[0].astype(jnp.float32)            # (C, TILE_HW)

    lab_sum = jnp.sum(l, axis=0, keepdims=True)   # (1, TILE_HW)
    keep = lab_sum != 0.0                         # torch.nonzero(labels.sum(1)) rows
    if need_mask:
        # Tail tile: lanes past the real H*W contain undefined data.  Mask them
        # out of `keep`; the jnp.where select below guarantees they contribute
        # exactly 0 even if the garbage is NaN/Inf.
        valid = hw - ti * tile_hw
        lane = lax.broadcasted_iota(jnp.int32, (1, tile_hw), 1)
        keep = jnp.logical_and(keep, lane < valid)

    num = jnp.sum(o * l, axis=0, keepdims=True)   # (1, TILE_HW)
    oo = jnp.sum(o * o, axis=0, keepdims=True)
    ll = jnp.sum(l * l, axis=0, keepdims=True)

    # num / (sqrt(oo)*sqrt(ll)) == num * rsqrt(oo*ll).  Select (not multiply)
    # zeroes dropped/out-of-bounds pixels without NaN leakage.  Kept pixels with
    # all-zero outputs give den=0 -> NaN, matching PyTorch.
    ratio = jnp.where(keep, num * lax.rsqrt(oo * ll), 0.0)

    psum_ref[...] += jnp.sum(ratio)
    pcnt_ref[...] += jnp.sum(keep.astype(jnp.float32))


def loss_fidelity_v2(outputs, labels, *, target_block_bytes=2 << 20):
    """outputs, labels: (b, c, h, w) NCHW, f32 or bf16. Returns scalar fidelity.

    `target_block_bytes` is the *sublane-padded* VMEM size of one input block
    (default 2 MiB; 4-8 MiB is a good choice on v6e/v7x if VMEM allows).
    """
    assert outputs.shape == labels.shape
    b, c, h, w = outputs.shape
    hw = h * w

    # Free layout change (no data movement): NCHW -> (B, C, H*W).
    out3 = outputs.reshape(b, c, hw)
    lab3 = labels.reshape(b, c, hw)

    itemsize = jnp.dtype(outputs.dtype).itemsize
    # VMEM pads the sublane (channel) axis: 8 rows for 32-bit, 16 for 16-bit.
    sublane = 8 * (4 // itemsize)
    c_pad = pl.cdiv(c, sublane) * sublane

    # Lane tile: largest multiple of 128 whose padded block fits the budget,
    # or the full H*W extent if the whole image already fits in one block.
    max_tile = max(128, (target_block_bytes // (c_pad * itemsize)) // 128 * 128)
    if hw <= max_tile:
        tile_hw, n_tiles = hw, 1
    else:
        tile_hw, n_tiles = max_tile, pl.cdiv(hw, max_tile)
    need_mask = (n_tiles * tile_hw != hw)

    # Explicit VMEM budget: 2 inputs x 2 buffers x padded block, plus f32 upcast
    # copies for sub-32-bit inputs and row-vector temporaries.  32 MiB floor is
    # safe on every generation (<= 64 MiB physical on v7x).
    block_vmem = c_pad * tile_hw * itemsize
    tmp_bytes = 12 * tile_hw * 4
    if itemsize != 4:
        tmp_bytes += 2 * (pl.cdiv(c, 8) * 8) * tile_hw * 4
    vmem_limit = int(max(2 * 2 * block_vmem + tmp_bytes + (2 << 20), 32 << 20))

    cost = pl.CostEstimate(
        flops=8 * b * c * hw,
        transcendentals=b * hw,                              # one rsqrt per pixel
        bytes_accessed=2 * b * c * hw * itemsize + 2 * b * 4,
    )

    kernel = functools.partial(
        _fidelity_kernel, hw=hw, tile_hw=tile_hw, need_mask=need_mask)

    psum, pcnt = pl.pallas_call(
        kernel,
        out_shape=(
            jax.ShapeDtypeStruct((b, 1, 1), jnp.float32),
            jax.ShapeDtypeStruct((b, 1, 1), jnp.float32),
        ),
        grid_spec=pltpu.PrefetchScalarGridSpec(
            num_scalar_prefetch=0,
            grid=(b, n_tiles),
            in_specs=[
                pl.BlockSpec((1, c, tile_hw), lambda bi, ti: (bi, 0, ti)),
                pl.BlockSpec((1, c, tile_hw), lambda bi, ti: (bi, 0, ti)),
            ],
            out_specs=[
                pl.BlockSpec((1, 1, 1), lambda bi, ti: (bi, 0, 0)),
                pl.BlockSpec((1, 1, 1), lambda bi, ti: (bi, 0, 0)),
            ],
        ),
        compiler_params=pltpu.CompilerParams(
            dimension_semantics=("parallel", "arbitrary"),
            vmem_limit_bytes=vmem_limit,
        ),
        cost_estimate=cost,
    )(out3, lab3)

    # Tiny epilogue: combine per-batch (sum, count).
    return jnp.sum(psum) / jnp.sum(pcnt)


def _reference_fidelity(outputs, labels):
    """Pure-JAX mirror of the PyTorch module (with its original permute path)."""
    b, c, h, w = outputs.shape
    o = jnp.transpose(outputs, (0, 2, 3, 1)).reshape(-1, c).astype(jnp.float32)
    l = jnp.transpose(labels, (0, 2, 3, 1)).reshape(-1, c).astype(jnp.float32)
    keep = jnp.sum(l, axis=1) != 0.0
    num = jnp.sum(o * l, axis=1)
    den = jnp.sqrt(jnp.sum(o * o, axis=1)) * jnp.sqrt(jnp.sum(l * l, axis=1))
    ratio = jnp.where(keep, num / jnp.where(keep, den, 1.0), 0.0)
    return jnp.sum(ratio) / jnp.sum(keep.astype(jnp.float32))


if __name__ == "__main__":
    key = jax.random.PRNGKey(0)
    k1, k2 = jax.random.split(key)

    # Case 1: default budget -> single full lane tile per image.
    b, c, h, w = 2, 4, 16, 16
    outputs = jax.random.uniform(k1, (b, c, h, w), dtype=jnp.float32) + 0.1
    labels = jax.random.uniform(k2, (b, c, h, w), dtype=jnp.float32)
    # Deterministically zero out some label pixels (all channels) so the
    # non-zero-row filtering path is actually exercised.
    zero_mask = (jnp.arange(h * w).reshape(h, w) % 7 == 0)
    labels = labels * (~zero_mask)[None, None, :, :].astype(jnp.float32)

    fid = jax.block_until_ready(loss_fidelity_v2(outputs, labels))
    ref = jax.block_until_ready(_reference_fidelity(outputs, labels))
    assert jnp.allclose(fid, ref, rtol=1e-5, atol=1e-6), (fid, ref)

    # Case 2: tiny budget -> TILE_HW = 128, 2 exact lane tiles per image
    # (exercises the accumulator-over-tiles path).
    fid_mt = jax.block_until_ready(
        loss_fidelity_v2(outputs, labels, target_block_bytes=2048))
    assert jnp.allclose(fid_mt, ref, rtol=1e-5, atol=1e-6), (fid_mt, ref)

    # Case 3: ragged H*W (160 pixels -> tiles of 128 + masked tail of 32;
    # exercises the in-kernel tail mask, no jnp.pad anywhere).
    h2, w2 = 16, 10
    o2 = jax.random.uniform(k1, (b, c, h2, w2), dtype=jnp.float32) + 0.1
    l2 = jax.random.uniform(k2, (b, c, h2, w2), dtype=jnp.float32)
    zm2 = (jnp.arange(h2 * w2).reshape(h2, w2) % 5 == 0)
    l2 = l2 * (~zm2)[None, None, :, :].astype(jnp.float32)
    fid2 = jax.block_until_ready(
        loss_fidelity_v2(o2, l2, target_block_bytes=2048))
    ref2 = jax.block_until_ready(_reference_fidelity(o2, l2))
    assert jnp.allclose(fid2, ref2, rtol=1e-5, atol=1e-6), (fid2, ref2)

    print("KERNEL_OK")
</pallas_src>

<mosaic_0001>
module attributes {stable_mosaic.version = 11 : i64} {
  func.func @_fidelity_kernel(%arg0: i32, %arg1: i32, %arg2: memref<1x4x256xf32, #tpu.memory_space<vmem>>, %arg3: memref<1x4x256xf32, #tpu.memory_space<vmem>>, %arg4: memref<1x1x1xf32, #tpu.memory_space<vmem>>, %arg5: memref<1x1x1xf32, #tpu.memory_space<vmem>>) attributes {dimension_semantics = [#tpu.dimension_semantics<parallel>, #tpu.dimension_semantics<arbitrary>], iteration_bounds = array<i64: 2, 1>, scalar_prefetch = 0 : i64, scratch_operands = 0 : i64, tpu.core_type = #tpu.core_type<tc>, window_params = [{transform_indices = @transform_0, window_bounds = array<i64: 1, 4, 256>}, {transform_indices = @transform_1, window_bounds = array<i64: 1, 4, 256>}, {transform_indices = @transform_2, window_bounds = array<i64: 1, 1, 1>}, {transform_indices = @transform_3, window_bounds = array<i64: 1, 1, 1>}]} {
    %c0_i32 = arith.constant 0 : i32
    %0 = arith.cmpi eq, %arg1, %c0_i32 : i32
    %1 = arith.extui %0 : i1 to i32
    %c0_i32_0 = arith.constant 0 : i32
    %2 = arith.cmpi ne, %1, %c0_i32_0 : i32
    scf.if %2 {
      %cst_25 = arith.constant 0.000000e+00 : f32
      %43 = vector.broadcast %cst_25 : f32 to vector<1x1x1xf32>
      %c0_26 = arith.constant 0 : index
      %c0_27 = arith.constant 0 : index
      %c0_28 = arith.constant 0 : index
      %44 = vector.load %arg4[%c0_26, %c0_27, %c0_28] : memref<1x1x1xf32, #tpu.memory_space<vmem>>, vector<1x1x1xf32>
      tpu.vector_store %arg4[%c0_26, %c0_27, %c0_28], %43 {strides = array<i32>} : memref<1x1x1xf32, #tpu.memory_space<vmem>>, vector<1x1x1xf32>,
      %cst_29 = arith.constant 0.000000e+00 : f32
      %45 = vector.broadcast %cst_29 : f32 to vector<1x1x1xf32>
      %c0_30 = arith.constant 0 : index
      %c0_31 = arith.constant 0 : index
      %c0_32 = arith.constant 0 : index
      %46 = vector.load %arg5[%c0_30, %c0_31, %c0_32] : memref<1x1x1xf32, #tpu.memory_space<vmem>>, vector<1x1x1xf32>
      tpu.vector_store %arg5[%c0_30, %c0_31, %c0_32], %45 {strides = array<i32>} : memref<1x1x1xf32, #tpu.memory_space<vmem>>, vector<1x1x1xf32>,
    } else {
    }
    %c0 = arith.constant 0 : index
    %c0_1 = arith.constant 0 : index
    %c0_2 = arith.constant 0 : index
    %3 = vector.load %arg2[%c0, %c0_1, %c0_2] : memref<1x4x256xf32, #tpu.memory_space<vmem>>, vector<1x4x256xf32>
    %4 = vector.shape_cast %3 : vector<1x4x256xf32> to vector<4x256xf32>
    %c0_3 = arith.constant 0 : index
    %c0_4 = arith.constant 0 : index
    %c0_5 = arith.constant 0 : index
    %5 = vector.load %arg3[%c0_3, %c0_4, %c0_5] : memref<1x4x256xf32, #tpu.memory_space<vmem>>, vector<1x4x256xf32>
    %6 = vector.shape_cast %5 : vector<1x4x256xf32> to vector<4x256xf32>
    %cst = arith.constant dense<0.000000e+00> : vector<256xf32>
    %7 = vector.multi_reduction <add>, %6, %cst [0] : vector<4x256xf32> to vector<256xf32>
    %8 = vector.shape_cast %7 : vector<256xf32> to vector<1x256xf32>
    %cst_6 = arith.constant 0.000000e+00 : f32
    %9 = vector.broadcast %cst_6 : f32 to vector<1x256xf32>
    %10 = arith.cmpf one, %8, %9 : vector<1x256xf32>
    %11 = arith.mulf %4, %6 : vector<4x256xf32>
    %cst_7 = arith.constant dense<0.000000e+00> : vector<256xf32>
    %12 = vector.multi_reduction <add>, %11, %cst_7 [0] : vector<4x256xf32> to vector<256xf32>
    %13 = vector.shape_cast %12 : vector<256xf32> to vector<1x256xf32>
    %14 = arith.mulf %4, %4 : vector<4x256xf32>
    %cst_8 = arith.constant dense<0.000000e+00> : vector<256xf32>
    %15 = vector.multi_reduction <add>, %14, %cst_8 [0] : vector<4x256xf32> to vector<256xf32>
    %16 = vector.shape_cast %15 : vector<256xf32> to vector<1x256xf32>
    %17 = arith.mulf %6, %6 : vector<4x256xf32>
    %cst_9 = arith.constant dense<0.000000e+00> : vector<256xf32>
    %18 = vector.multi_reduction <add>, %17, %cst_9 [0] : vector<4x256xf32> to vector<256xf32>
    %19 = vector.shape_cast %18 : vector<256xf32> to vector<1x256xf32>
    %20 = arith.mulf %16, %19 : vector<1x256xf32>
    %21 = math.rsqrt %20 : vector<1x256xf32>
    %22 = arith.mulf %13, %21 : vector<1x256xf32>
    %cst_10 = arith.constant 0.000000e+00 : f32
    %23 = vector.broadcast %cst_10 : f32 to vector<1x256xf32>
    %24 = arith.select %10, %22, %23 : vector<1x256xi1>, vector<1x256xf32>
    %c0_11 = arith.constant 0 : index
    %c0_12 = arith.constant 0 : index
    %c0_13 = arith.constant 0 : index
    %25 = vector.load %arg4[%c0_11, %c0_12, %c0_13] : memref<1x1x1xf32, #tpu.memory_space<vmem>>, vector<1x1x1xf32>
    %26 = vector.shape_cast %24 : vector<1x256xf32> to vector<1x1x256xf32>
    %cst_14 = arith.constant dense<0.000000e+00> : vector<1xf32>
    %27 = vector.multi_reduction <add>, %26, %cst_14 [1, 2] : vector<1x1x256xf32> to vector<1xf32>
    %28 = vector.shape_cast %27 : vector<1xf32> to vector<1x1x1xf32>
    %29 = vector.extract %28[0, 0, 0] : f32 from vector<1x1x1xf32>
    %30 = vector.broadcast %29 : f32 to vector<1x1x1xf32>
    %31 = arith.addf %25, %30 : vector<1x1x1xf32>
    %c0_15 = arith.constant 0 : index
    %c0_16 = arith.constant 0 : index
    %c0_17 = arith.constant 0 : index
    %32 = vector.load %arg4[%c0_15, %c0_16, %c0_17] : memref<1x1x1xf32, #tpu.memory_space<vmem>>, vector<1x1x1xf32>
    tpu.vector_store %arg4[%c0_15, %c0_16, %c0_17], %31 {strides = array<i32>} : memref<1x1x1xf32, #tpu.memory_space<vmem>>, vector<1x1x1xf32>,
    %c0_18 = arith.constant 0 : index
    %c0_19 = arith.constant 0 : index
    %c0_20 = arith.constant 0 : index
    %33 = vector.load %arg5[%c0_18, %c0_19, %c0_20] : memref<1x1x1xf32, #tpu.memory_space<vmem>>, vector<1x1x1xf32>
    %34 = arith.extui %10 : vector<1x256xi1> to vector<1x256xi32>
    %35 = arith.sitofp %34 : vector<1x256xi32> to vector<1x256xf32>
    %36 = vector.shape_cast %35 : vector<1x256xf32> to vector<1x1x256xf32>
    %cst_21 = arith.constant dense<0.000000e+00> : vector<1xf32>
    %37 = vector.multi_reduction <add>, %36, %cst_21 [1, 2] : vector<1x1x256xf32> to vector<1xf32>
    %38 = vector.shape_cast %37 : vector<1xf32> to vector<1x1x1xf32>
    %39 = vector.extract %38[0, 0, 0] : f32 from vector<1x1x1xf32>
    %40 = vector.broadcast %39 : f32 to vector<1x1x1xf32>
    %41 = arith.addf %33, %40 : vector<1x1x1xf32>
    %c0_22 = arith.constant 0 : index
    %c0_23 = arith.constant 0 : index
    %c0_24 = arith.constant 0 : index
    %42 = vector.load %arg5[%c0_22, %c0_23, %c0_24] : memref<1x1x1xf32, #tpu.memory_space<vmem>>, vector<1x1x1xf32>
    tpu.vector_store %arg5[%c0_22, %c0_23, %c0_24], %41 {strides = array<i32>} : memref<1x1x1xf32, #tpu.memory_space<vmem>>, vector<1x1x1xf32>,
    return
  }
  func.func @transform_0(%arg0: i32, %arg1: i32) -> (i32, i32, i32) {
    %c0_i32 = arith.constant 0 : i32
    %c0_i32_0 = arith.constant 0 : i32
    return %arg0, %c0_i32, %arg1 : i32, i32, i32
  }
  func.func @transform_1(%arg0: i32, %arg1: i32) -> (i32, i32, i32) {
    %c0_i32 = arith.constant 0 : i32
    %c0_i32_0 = arith.constant 0 : i32
    return %arg0, %c0_i32, %arg1 : i32, i32, i32
  }
  func.func @transform_2(%arg0: i32, %arg1: i32) -> (i32, i32, i32) {
    %c0_i32 = arith.constant 0 : i32
    %c0_i32_0 = arith.constant 0 : i32
    %c0_i32_1 = arith.constant 0 : i32
    return %arg0, %c0_i32, %c0_i32_0 : i32, i32, i32
  }
  func.func @transform_3(%arg0: i32, %arg1: i32) -> (i32, i32, i32) {
    %c0_i32 = arith.constant 0 : i32
    %c0_i32_0 = arith.constant 0 : i32
    %c0_i32_1 = arith.constant 0 : i32
    return %arg0, %c0_i32, %c0_i32_0 : i32, i32, i32
  }
}

</mosaic_0001>

<bundles_post_ra>
// kernel: tpu_custom_call.1
= control target key start
LH: loop header
LB: loop body
LE: loop exit
PB: predicated region body
PF: predicated region fallthrough
CT: control target
= control target key end

     0   :  { %9 = vsyncpa [#allocation3], 0  ;;  %s919_s0 = inlined_call_operand.hbm [shape: f32[2,4,256], index: 0, kind: input, shape index: {}]   ;;  %s920_s1 = inlined_call_operand.hbm [shape: f32[2,4,256], index: 1, kind: input, shape index: {}]   ;;  %s921_s2 = inlined_call_operand.vmem [shape: f32[2,1,1], index: 2, kind: output, shape index: {0}]   ;;  %s922_s3 = inlined_call_operand.vmem [shape: f32[2,1,1], index: 3, kind: output, shape index: {1}]  }
   0x1   :  { %11 = vsyncpa [#allocation3 + $0x1], 0 }
   0x2   :  { %12 = vsyncpa [#allocation5], 0 }
   0x3   :  { %14 = vsyncpa [#allocation5 + $0x1], 0  ;;  %s732_s12 = smov 0   ;;  %s734_s13 = smov 0  }
   0x4   :  { %s736_s14 = smov 0   ;;  %s738_s15 = smov 0  }
   0x5   :  { %s740_s16 = smov 0   ;;  %s742_s17 = smov 0  }
   0x6 LB: > { %s504_s18 = sadd.s32 4294967295, %s707_s17   ;;  %s32_s19 = sadd.s32 1, %s703_s16  ;;  %s707_s17 = sphi %s742_s17, %s20_s17   ;;  %s703_s16 = sphi %s740_s16, %s936_s16   ;;  %s699_s15 = sphi %s738_s15, %s935_s15   ;;  %s695_s14 = sphi %s736_s14, %s934_s14   ;;  %s691_s13 = sphi %s734_s13, %s933_s13   ;;  %s687_s12 = sphi %s732_s12, %s932_s12  }
   0x7   : > { %p34_p0 = scmp.ge.s32.totalorder %s32_s19, 2  ;;  %s41_s20 = sadd.s32 1, %s695_s14 }
   0x8   : > { %p48_p1 = scmp.ne.s32.totalorder %s695_s14, %s691_s13  ;;  %p49_p2 = scmp.eq.s32.totalorder %s707_s17, 0 }
   0x9   : > { %s938_s19 = smov (%p34_p0, %s32_s19), 0  ;;  %p54_p4 = scmp.ne.s32.totalorder %s691_s13, %s687_s12 }
   0xa   : > { %p768_p3 = por %p49_p2, %p48_p1  ;;  %s36_s22 = ssub.s32 %s703_s16, %s938_s19 }
   0xb   : > { %p55_p5 = scmp.eq.s32.totalorder %s504_s18, 0  ;;  %p39_p6 = scmp.eq.s32.totalorder %s36_s22, 0 }
   0xc   : > { %p538_p8 = scmp.lt.s32.totalorder %s707_s17, 2  ;;  %s784_s25 = sand.u32 1, %s695_s14  }
   0xd   : > { %p775_p7 = por %p55_p5, %p54_p4  ;;  %s521_s26 = sshll.u32 %s703_s16, 7 }
   0xe   : > { %s781_s24 = scalar_select %p39_p6, %s695_s14, %s41_s20  }
   0xf   : > { %s925_s23 = scalar_select %p775_p7, 1, 0 }
  0x10   : > { %s508_s27 = sshll.u32 %s784_s25, 3  ;;  %s793_s30 = scalar_lea.hbm %s919_s0, %s521_s26 }
  0x11   : > { %s162_s4 = scalar_lea.vmem [#allocation2], %s508_s27  ;;  %p799_p9 = pnand %p538_p8, %p768_p3 }
  0x12   : > { %s172_s5 = sshll.u32 %s162_s4, 4  ;;  %s159_s7 = scalar_lea.sflag [#allocation3], %s784_s25  ;;  %s803_s5 = int_to_ptr.vmem [resolvable:$true] %s172_s5 }
  0x13   : > { %s593_s8 = scalar_lea.hbm %s793_s30, 128  ;;  %p595_p13 = pneg %p799_p9 }
  0x14   : > { %p594_p12 = scmp.ne.s32.totalorder %s793_s30, %s593_s8  ;;  %s598_s11 = scalar_lea.hbm %s919_s0, 256 }
  0x15   : > { %p599_p2 = scmp.lt.u32.totalorder %s793_s30, %s919_s0  ;;  %p600_p3 = scmp.lt.u32.totalorder %s598_s11, %s593_s8 }
  0x16   : > { %p596_p0 = pnand %p595_p13, %p594_p12  ;;  %p602_p5 = scmp.lt.u32.totalorder %s593_s8, %s793_s30 }
  0x17   : > { %p601_p4 = por %p600_p3, %p599_p2 }
  0x18   : > { %p597_p1 = pneg %p596_p0 }
  0x19   : > { %p603_p6 = por %p602_p5, %p601_p4 }
  0x1b   : > { %p604_p8 = pnand %p603_p6, %p597_p1 }
  0x1d   : > { %607 = shalt.err (!%p604_p8)
}
  0x1e   : > { %s608_s20 = scalar_lea.vmem %s803_s5, 128  ;;  %s709_s21 = smov [#allocation2]  }
  0x1f   : > { %p609_p12 = scmp.ne.s32.totalorder %s803_s5, %s608_s20  ;;  %s613_s22 = sshll.u32 %s709_s21, 4  ;;  %s614_s22 = int_to_ptr.vmem [resolvable:$false] %s613_s22 }
  0x20   : > { %s615_s28 = scalar_lea.vmem %s614_s22, 256  ;;  %p616_p11 = scmp.lt.s32.totalorder %s803_s5, %s614_s22 }
  0x21   : > { %p611_p0 = pnand %p609_p12, %p595_p13  ;;  %p617_p2 = scmp.lt.s32.totalorder %s615_s28, %s608_s20 }
  0x23   : > { %p612_p10 = pneg %p611_p0  ;;  %p618_p3 = por %p617_p2, %p616_p11 }
  0x25   : > { %p619_p4 = pnand %p618_p3, %p612_p10 }
  0x27   : > { %622 = shalt.err (!%p619_p4)
}
  0x28   : > { %534 = dma.hbm_to_vmem [thread:$0]  (!%p799_p9), %s793_s30, 128, %s803_s5, %s159_s7  }
  0x29   : > { %p927_p1 = scmp.lt.s32.totalorder %s707_s17, 3  ;;  %p928_p5 = scmp.ge.s32.totalorder %s707_s17, 1 }
  0x2a   : > { %s846_s9 = scalar_lea.hbm %s920_s1, %s521_s26  ;;  %s183_s10 = scalar_lea.vmem [#allocation4], %s508_s27 }
  0x2b   : > { %p837_p6 = pnand %p928_p5, %p927_p1  ;;  %s193_s11 = sshll.u32 %s183_s10, 4  ;;  %s194_s11 = int_to_ptr.vmem [resolvable:$true] %s193_s11 }
  0x2c   : > { %s180_s30 = scalar_lea.sflag [#allocation5], %s784_s25  ;;  %s623_s5 = scalar_lea.hbm %s846_s9, 128 }
  0x2d   : > { %s929_s29 = scalar_select %p837_p6, 1, 0 }
  0x2e   : > { %p624_p10 = scmp.ne.s32.totalorder %s846_s9, %s623_s5  ;;  %s628_s26 = scalar_lea.hbm %s920_s1, 256 }
  0x2f   : > { %p629_p12 = scmp.lt.u32.totalorder %s846_s9, %s920_s1  ;;  %p630_p0 = scmp.lt.u32.totalorder %s628_s26, %s623_s5 }
  0x30   : > { %p626_p11 = pnand %p624_p10, %p595_p13  ;;  %p632_p3 = scmp.lt.u32.totalorder %s623_s5, %s846_s9 }
  0x31   : > { %p631_p2 = por %p630_p0, %p629_p12 }
  0x32   : > { %p627_p8 = pneg %p626_p11 }
  0x33   : > { %p633_p4 = por %p632_p3, %p631_p2 }
  0x35   : > { %p634_p1 = pnand %p633_p4, %p627_p8 }
  0x37   : > { %637 = shalt.err (!%p634_p1)
}
  0x38   : > { %s638_s25 = scalar_lea.vmem %s194_s11, 128  ;;  %s710_s27 = smov [#allocation4]  }
  0x39   : > { %p639_p5 = scmp.ne.s32.totalorder %s194_s11, %s638_s25  ;;  %s643_s21 = sshll.u32 %s710_s27, 4  ;;  %s644_s21 = int_to_ptr.vmem [resolvable:$false] %s643_s21 }
  0x3a   : > { %s645_s22 = scalar_lea.vmem %s644_s21, 256  ;;  %p646_p7 = scmp.lt.s32.totalorder %s194_s11, %s644_s21 }
  0x3b   : > { %p641_p10 = pnand %p639_p5, %p595_p13  ;;  %p647_p6 = scmp.lt.s32.totalorder %s645_s22, %s638_s25 }
  0x3d   : > { %p642_p11 = pneg %p641_p10  ;;  %p648_p0 = por %p647_p6, %p646_p7 }
  0x3f   : > { %p649_p12 = pnand %p648_p0, %p642_p11 }
  0x41   : > { %652 = shalt.err (!%p649_p12)
}
  0x42   : > { %537 = dma.hbm_to_vmem [thread:$0]  (!%p799_p9), %s846_s9, 128, %s194_s11, %s180_s30  }
  0x43   : > { %p930_p8 = scmp.ne.s32.totalorder %s929_s29, 0 }
  0x44   : > { %s204_s28 = sand.u32 (!%p930_p8), 1, %s691_s13   ;;  %p931_p13 = scmp.ne.s32.totalorder (!%p930_p8), %s925_s23, 0 }
  0x45   : > { %202 = sbr.rel (%p930_p8) target bundleno = 329 (0x149), region = 28  ;;  %s515_s4 = sshll.u32 (!%p930_p8), %s204_s28, 3 }
  0x46   : > { %s205_s8 = scalar_lea.sflag (!%p930_p8), [#allocation3], %s204_s28  ;;  %s208_s10 = scalar_lea.vmem (!%p930_p8), [#allocation2], %s515_s4 }
  0x4c   : > { %678 = dma.done.wait (%p931_p13), %s205_s8, 128  }
  0x4d   : > { %680 = vsyncadd (%p931_p13), %s205_s8, 4294967168  ;;  %s214_s5 = scalar_lea.sflag [#allocation5], %s204_s28  ;;  %s217_s7 = scalar_lea.vmem [#allocation4], %s515_s4 }
  0x4e   : > { %682 = dma.done.wait (%p931_p13), %s214_s5, 128  }
  0x4f   : > { %684 = vsyncadd (%p931_p13), %s214_s5, 4294967168  ;;  %v261_v0 = vld [vmem:[%s208_s10] sm:$0xff]  ;;  %v262_v1 = vld [vmem:[%s217_s7] sm:$0xff]  ;;  %vm266_vm0 = vcmask 1043456   ;;  %vm346_vm3 = vcmask 1040384   ;;  %p248_p7 = scmp.lt.s32.totalorder %s699_s15, 1 }
  0x50   : > { %v283_v2 = vmul.f32 %v262_v1, %v261_v0  ;;  %v301_v3 = vmul.f32 %v261_v0, %v261_v0  ;;  %v264_v4 = vcombine.high %v262_v1, %v262_v1  ;;  %v319_v5 = vmul.f32 %v262_v1, %v262_v1 }
  0x51   : > { %v267_v9 = vsel %vm266_vm0, %v262_v1, 0.0  ;;  %s940_s15 = smov (!%p248_p7, %s699_s15), 1  ;;  %vm258_vm4 = vcmask 0  }
  0x52   : > { %v285_v6 = vcombine.high %v283_v2, %v283_v2  ;;  %v303_v7 = vcombine.high %v301_v3, %v301_v3  ;;  %v305_v8 = vsel %vm266_vm0, %v301_v3, 0.0  ;;  %v321_v12 = vcombine.high %v319_v5, %v319_v5  ;;  %s250_s29 = scalar_lea.vmem %s921_s2, %s940_s15  ;;  %s253_s30 = scalar_lea.vmem %s922_s3, %s940_s15 }
  0x53   : > { %v306_v10 = vrot.slane %v305_v8, 4  ;;  %v274_v13 = vsel %vm266_vm0, %v264_v4, 0.0  ;;  %v287_v14 = vsel %vm266_vm0, %v283_v2, 0.0  ;;  %v323_v18 = vsel %vm266_vm0, %v319_v5, 0.0 }
  0x54   : > { %v312_v11 = vsel %vm266_vm0, %v303_v7, 0.0  ;;  %v294_v15 = vsel %vm266_vm0, %v285_v6, 0.0  ;;  %v330_v19 = vsel %vm266_vm0, %v321_v12, 0.0  ;;  %v268_v20 = vrot.slane %v267_v9, 4 }
  0x55   : > { %v307_v16 = vadd.f32 %v306_v10, %v305_v8  ;;  %v313_v17 = vrot.slane %v312_v11, 4  ;;  %v324_v23 = vrot.slane %v323_v18, 4  ;;  %v331_v24 = vrot.slane %v330_v19, 4 }
  0x56   : > { %v275_v25 = vrot.slane %v274_v13, 4  ;;  %v288_v26 = vrot.slane %v287_v14, 4  ;;  %v295_v27 = vrot.slane %v294_v15, 4  ;;  %v269_v32 = vadd.f32 %v268_v20, %v267_v9 }
  0x57   : > { %v308_v21 = vrot.slane %v307_v16, 2  ;;  %v314_v22 = vadd.f32 %v313_v17, %v312_v11  ;;  %v325_v30 = vadd.f32 %v324_v23, %v323_v18  ;;  %v332_v31 = vadd.f32 %v331_v24, %v330_v19 }
  0x58   : > { %v276_v37 = vadd.f32 %v275_v25, %v274_v13  ;;  %v289_v38 = vadd.f32 %v288_v26, %v287_v14  ;;  %v296_v39 = vadd.f32 %v295_v27, %v294_v15  ;;  %v270_v43 = vrot.slane %v269_v32, 2 }
  0x59   : > { %v309_v28 = vadd.f32 %v308_v21, %v307_v16  ;;  %v315_v29 = vrot.slane %v314_v22, 2  ;;  %v326_v35 = vrot.slane %v325_v30, 2  ;;  %v333_v36 = vrot.slane %v332_v31, 2 }
  0x5a   : > { %v277_v48 = vrot.slane %v276_v37, 2  ;;  %v290_v49 = vrot.slane %v289_v38, 2  ;;  %v297_v50 = vrot.slane %v296_v39, 2  ;;  %v271_v53 = vadd.f32 %v270_v43, %v269_v32 }
  0x5b   : > { %v310_v33 = vrot.slane %v309_v28, 1  ;;  %v316_v34 = vadd.f32 %v315_v29, %v314_v22  ;;  %v327_v41 = vadd.f32 %v326_v35, %v325_v30  ;;  %v334_v42 = vadd.f32 %v333_v36, %v332_v31 }
  0x5c   : > { %v278_v56 = vadd.f32 %v277_v48, %v276_v37  ;;  %v291_v57 = vadd.f32 %v290_v49, %v289_v38  ;;  %v298_v58 = vadd.f32 %v297_v50, %v296_v39  ;;  %v272_v59 = vrot.slane %v271_v53, 1 }
  0x5d   : > { %v317_v40 = vrot.slane %v316_v34, 1  ;;  %v311_v44 = vadd.f32 %v310_v33, %v309_v28  ;;  %v328_v46 = vrot.slane %v327_v41, 1  ;;  %v335_v47 = vrot.slane %v334_v42, 1 }
  0x5e   : > { %v279_v60 = vrot.slane %v278_v56, 1  ;;  %v292_v61 = vrot.slane %v291_v57, 1  ;;  %v299_v62 = vrot.slane %v298_v58, 1  ;;  %v273_v63 = vadd.f32 %v272_v59, %v271_v53 }
  0x5f   : > { %v318_v45 = vadd.f32 %v317_v40, %v316_v34  ;;  %v329_v51 = vadd.f32 %v328_v46, %v327_v41  ;;  %v336_v52 = vadd.f32 %v335_v47, %v334_v42  ;;  %v711_v7 = vmov 0.0  }
  0x60   : > { %v280_v0 = vadd.f32 %v279_v60, %v278_v56  ;;  %v293_v1 = vadd.f32 %v292_v61, %v291_v57  ;;  %v300_v2 = vadd.f32 %v299_v62, %v298_v58  ;;  %vm281_vm1 = vcmp.ne.f32.partialorder %v273_v63, 0.0  ;;  %259 = vst.msk [vmem:[%s250_s29] sm:$0x1] %vm258_vm4, %v711_v7  ;;  %260 = vst.msk [vmem:[%s253_s30] sm:$0x1] %vm258_vm4, %v711_v7 }
  0x61   : > { %v337_v54 = vmul.f32 %v329_v51, %v311_v44  ;;  %v338_v55 = vmul.f32 %v336_v52, %v318_v45  ;;  %v517_v8 = vsel %vm281_vm1, 1.0, %v711_v7 }
  0x62   : > { %vm282_vm2 = vcmp.ne.f32.partialorder %v280_v0, 0.0  ;;  %v368_v14 = vsel %vm346_vm3, %v517_v8, 0.0 }
  0x63   : > { %589 = vrsqrt.f32 %v337_v54  ;;  %v518_v9 = vsel %vm282_vm2, 1.0, %v711_v7 }
  0x64   : > { %591 = vrsqrt.f32 %v338_v55  ;;  %v369_v15 = vsel %vm346_vm3, %v518_v9, 0.0 }
  0x65   : > { %v370_v17 = vadd.f32 %v369_v15, %v368_v14 }
  0x67   : > { %v345_v32 = vld [vmem:[%s250_s29] sm:$0x1] }
  0x68   : > { %v363_v35 = vld [vmem:[%s253_s30] sm:$0x1] }
  0x6d   : > { %v590_v3 = vpop.eup %589 }
  0x6e   : > { %v592_v4 = vpop.eup %591  ;;  %v341_v5 = vmul.f32 %v590_v3, %v293_v1 }
  0x6f   : > { %v342_v6 = vmul.f32 %v592_v4, %v300_v2 }
  0x70   : > { %v343_v10 = vsel %vm281_vm1, %v341_v5, 0.0 }
  0x71   : > { %v344_v11 = vsel %vm282_vm2, %v342_v6, 0.0  ;;  %v347_v12 = vsel %vm346_vm3, %v343_v10, 0.0 }
  0x72   : > { %v348_v13 = vsel %vm346_vm3, %v344_v11, 0.0 }
  0x73   : > { %v349_v16 = vadd.f32 %v348_v13, %v347_v12 }
  0x75   : > { %350 = vadd.xlane.f32.xlu0 %v349_v16 }
  0x79   : > { %371 = vadd.xlane.f32.xlu0 %v370_v17 }
 0x102   : > { %v351_v18 = vpop.xlane.xlu0 %350 }
 0x103   : > { %v352_v19 = vrot.slane %v351_v18, 4 }
 0x105   : > { %v353_v20 = vadd.f32 %v352_v19, %v351_v18 }
 0x106   : > { %v372_v21 = vpop.xlane.xlu0 %371 }
 0x107   : > { %v354_v22 = vrot.slane %v353_v20, 2  ;;  %v373_v23 = vrot.slane %v372_v21, 4 }
 0x109   : > { %v374_v24 = vadd.f32 %v373_v23, %v372_v21  ;;  %v355_v25 = vadd.f32 %v354_v22, %v353_v20 }
 0x10b   : > { %v375_v26 = vrot.slane %v374_v24, 2  ;;  %v356_v27 = vrot.slane %v355_v25, 1 }
 0x10d   : > { %v376_v28 = vadd.f32 %v375_v26, %v374_v24  ;;  %v357_v29 = vadd.f32 %v356_v27, %v355_v25 }
 0x10f   : > { %523 = vpush %v357_v29  ;;  %v377_v30 = vrot.slane %v376_v28, 1 }
 0x111   : > { %v378_v31 = vadd.f32 %v377_v30, %v376_v28 }
 0x113   : > { %525 = vpush %v378_v31 }
 0x140   : > { %s524_s15 = spop %523 }
 0x141   : > { %v359_v33 = vstv %s524_s15 }
 0x142   : > { %v360_v34 = vadd.f32 %v359_v33, %v345_v32 }
 0x144   : > { %362 = vst.msk [vmem:[%s250_s29] sm:$0x1] %vm258_vm4, %v360_v34  ;;  %s526_s12 = spop %525 }
 0x145   : > { %v380_v36 = vstv %s526_s12 }
 0x146   : > { %v381_v37 = vadd.f32 %v380_v36, %v363_v35 }
 0x148   : > { %382 = vst.msk [vmem:[%s253_s30] sm:$0x1] %vm258_vm4, %v381_v37 }
 0x149 PF: > { %s20_s17 = sadd.s32 1, %s707_s17   ;;  %s932_s12 = smov %s691_s13 }
 0x14a   : > { %p17_p9 = scmp.ge.s32.totalorder %s20_s17, 4   ;;  %s933_s13 = smov %s695_s14 }
 0x14b   : > { %s934_s14 = smov %s781_s24  ;;  %s935_s15 = smov %s703_s16 }
 0x14c   : > { %s936_s16 = smov %s938_s19  ;;  %19 = sbr.rel (!%p17_p9) target bundleno = 6 (0x6), region = 97 }
 0x153   :  { %412 = vsyncpa [#allocation3], 1 }
 0x154   :  { %414 = vsyncpa [#allocation3 + $0x1], 1 }
 0x155   :  { %415 = vsyncpa [#allocation5], 1 }
 0x156   :  { %417 = vsyncpa [#allocation5 + $0x1], 1 }

</bundles_post_ra>
